<compile_context>
chip_gen: v6e
topology: v6e:2x2x1
jax: 0.10.0
libtpu: 0.0.40
codegen_flags: <defaults>
</compile_context>

<pallas_src>
import functools

import jax
import jax.numpy as jnp
from jax import lax
from jax.experimental import pallas as pl
from jax.experimental.pallas import tpu as pltpu

_LANES = 128
_SUBLANES = 8
_MAX_BLOCK_ROWS = 1024  # (1024, 128) f32 tile = 512 KiB; in+out double-buffered ~2 MiB


def _gaussian_noise_kernel(seed_ref, x_ref, o_ref, *, scale, bias, block_rows):
    """out = clip(x + (scale * U[0,1) + bias), 0, 1) with a counter-based hash PRNG."""
    rows, lanes = x_ref.shape

    # Global element index of every element of this block.
    row = lax.broadcasted_iota(jnp.int32, (rows, lanes), 0)
    col = lax.broadcasted_iota(jnp.int32, (rows, lanes), 1)
    gidx = (pl.program_id(0) * block_rows + row) * lanes + col

    # lowbias32 hash of (global index, seed) -> well-mixed 32 random bits.
    seed = seed_ref[0].astype(jnp.uint32) * jnp.uint32(0x9E3779B9)
    h = gidx.astype(jnp.uint32) + seed
    h = h ^ (h >> jnp.uint32(16))
    h = h * jnp.uint32(0x7FEB352D)
    h = h ^ (h >> jnp.uint32(15))
    h = h * jnp.uint32(0x846CA68B)
    h = h ^ (h >> jnp.uint32(16))

    # Top 24 bits -> uniform [0, 1) (exact in f32, no bitcast needed).
    u = (h >> jnp.uint32(8)).astype(jnp.int32).astype(jnp.float32)
    u = u * jnp.float32(1.0 / (1 << 24))

    noise = jnp.float32(scale) * u + jnp.float32(bias)
    y = x_ref[...].astype(jnp.float32) + noise
    o_ref[...] = jnp.clip(y, 0.0, 1.0).astype(o_ref.dtype)


@functools.partial(jax.jit, static_argnames=("mean", "std"))
def _gaussian_noise_jit(x, seed_arr, mean, std):
    orig_shape = x.shape
    orig_dtype = x.dtype

    n = x.size
    tile_elems = _SUBLANES * _LANES
    pad = (-n) % tile_elems

    flat = x.reshape(-1)
    if pad:
        # Only taken when n is not a multiple of 8*128 (rare for image tensors).
        flat = jnp.pad(flat, (0, pad))
    rows = (n + pad) // _LANES                      # multiple of 8
    block_rows = min(_MAX_BLOCK_ROWS, rows)         # multiple of 8
    grid = (pl.cdiv(rows, block_rows),)

    x2 = flat.reshape(rows, _LANES)

    scale = 2.0 * std          # folded at trace time
    bias = mean - std

    out2 = pl.pallas_call(
        functools.partial(
            _gaussian_noise_kernel, scale=scale, bias=bias, block_rows=block_rows
        ),
        out_shape=jax.ShapeDtypeStruct(x2.shape, orig_dtype),
        grid_spec=pltpu.PrefetchScalarGridSpec(
            num_scalar_prefetch=1,
            grid=grid,
            in_specs=[pl.BlockSpec((block_rows, _LANES), lambda i, seed: (i, 0))],
            out_specs=pl.BlockSpec((block_rows, _LANES), lambda i, seed: (i, 0)),
        ),
        compiler_params=pltpu.CompilerParams(
            dimension_semantics=("parallel",),
        ),
    )(seed_arr, x2)

    out_flat = out2.reshape(-1)
    if pad:
        out_flat = out_flat[:n]
    return out_flat.reshape(orig_shape)


def gaussian_noise(x, seed: int, mean: float = 0.0, std: float = 1.0):
    """doctr GaussianNoise float path: clamp(x + (mean + 2*std*U[0,1) - std), 0, 1)."""
    # TODO(synk): uint8 branch ((x + 255*noise).round().clamp(0,255)) not wired;
    # float path only (test inputs are float32).
    seed_arr = jnp.asarray([seed], dtype=jnp.int32)
    return _gaussian_noise_jit(x, seed_arr, float(mean), float(std))


if __name__ == "__main__":
    key = jax.random.PRNGKey(0)
    # Small NCHW input, values in [0, 1] like an image tensor.
    x = jax.random.uniform(key, (2, 4, 16, 16), dtype=jnp.float32)

    mean, std = 0.0, 1.0
    out = gaussian_noise(x, seed=0, mean=mean, std=std)
    out = jax.block_until_ready(out)

    # Sanity checks: shape/dtype preserved, output clamped to [0, 1],
    # and each element within [x + mean - std, x + mean + std] before clamp.
    assert out.shape == x.shape and out.dtype == x.dtype
    assert bool(jnp.all(out >= 0.0)) and bool(jnp.all(out <= 1.0))
    lo = jnp.clip(x + mean - std, 0.0, 1.0)
    hi = jnp.clip(x + mean + std, 0.0, 1.0)
    assert bool(jnp.all(out >= lo - 1e-6)) and bool(jnp.all(out <= hi + 1e-6))

    # Noise is actually applied (output differs from plain clamp(x)) and is
    # seed-dependent.
    assert bool(jnp.any(jnp.abs(out - jnp.clip(x, 0.0, 1.0)) > 1e-3))
    out_other_seed = jax.block_until_ready(gaussian_noise(x, seed=1, mean=mean, std=std))
    assert bool(jnp.any(jnp.abs(out - out_other_seed) > 1e-3))

    print("KERNEL_OK")
</pallas_src>

<mosaic_0001>
module attributes {stable_mosaic.version = 11 : i64} {
  func.func @_gaussian_noise_kernel(%arg0: i32, %arg1: memref<1xi32, #tpu.memory_space<smem>>, %arg2: memref<16x128xf32, #tpu.memory_space<vmem>>, %arg3: memref<16x128xf32, #tpu.memory_space<vmem>>) attributes {dimension_semantics = [#tpu.dimension_semantics<parallel>], iteration_bounds = array<i64: 1>, scalar_prefetch = 1 : i64, scratch_operands = 0 : i64, tpu.core_type = #tpu.core_type<tc>, window_params = [{transform_indices = @transform_0, window_bounds = array<i64: 16, 128>}, {transform_indices = @transform_1, window_bounds = array<i64: 16, 128>}]} {
    %0 = tpu.iota {dimensions = array<i32: 0>} : vector<16x128xi32>
    %1 = tpu.iota {dimensions = array<i32: 1>} : vector<16x128xi32>
    %c16_i32 = arith.constant 16 : i32
    %2 = arith.muli %arg0, %c16_i32 : i32
    %3 = vector.broadcast %2 : i32 to vector<16x128xi32>
    %4 = arith.addi %3, %0 : vector<16x128xi32>
    %c128_i32 = arith.constant 128 : i32
    %5 = vector.broadcast %c128_i32 : i32 to vector<16x128xi32>
    %6 = arith.muli %4, %5 : vector<16x128xi32>
    %7 = arith.addi %6, %1 : vector<16x128xi32>
    %c0 = arith.constant 0 : index
    %8 = memref.load %arg1[%c0] : memref<1xi32, #tpu.memory_space<smem>>
    %c-1640531527_i32 = arith.constant -1640531527 : i32
    %9 = arith.muli %8, %c-1640531527_i32 : i32
    %10 = vector.broadcast %9 : i32 to vector<16x128xi32>
    %11 = arith.addi %7, %10 : vector<16x128xi32>
    %c16_i32_0 = arith.constant 16 : i32
    %12 = vector.broadcast %c16_i32_0 : i32 to vector<16x128xi32>
    %13 = arith.shrui %11, %12 : vector<16x128xi32>
    %14 = arith.xori %11, %13 : vector<16x128xi32>
    %c2146121005_i32 = arith.constant 2146121005 : i32
    %15 = vector.broadcast %c2146121005_i32 : i32 to vector<16x128xi32>
    %16 = arith.muli %14, %15 : vector<16x128xi32>
    %c15_i32 = arith.constant 15 : i32
    %17 = vector.broadcast %c15_i32 : i32 to vector<16x128xi32>
    %18 = arith.shrui %16, %17 : vector<16x128xi32>
    %19 = arith.xori %16, %18 : vector<16x128xi32>
    %c-2073254261_i32 = arith.constant -2073254261 : i32
    %20 = vector.broadcast %c-2073254261_i32 : i32 to vector<16x128xi32>
    %21 = arith.muli %19, %20 : vector<16x128xi32>
    %c16_i32_1 = arith.constant 16 : i32
    %22 = vector.broadcast %c16_i32_1 : i32 to vector<16x128xi32>
    %23 = arith.shrui %21, %22 : vector<16x128xi32>
    %24 = arith.xori %21, %23 : vector<16x128xi32>
    %c8_i32 = arith.constant 8 : i32
    %25 = vector.broadcast %c8_i32 : i32 to vector<16x128xi32>
    %26 = arith.shrui %24, %25 : vector<16x128xi32>
    %27 = arith.sitofp %26 : vector<16x128xi32> to vector<16x128xf32>
    %cst = arith.constant 5.96046448E-8 : f32
    %28 = vector.broadcast %cst : f32 to vector<16x128xf32>
    %29 = arith.mulf %27, %28 : vector<16x128xf32>
    %cst_2 = arith.constant 2.000000e+00 : f32
    %30 = vector.broadcast %cst_2 : f32 to vector<16x128xf32>
    %31 = arith.mulf %30, %29 : vector<16x128xf32>
    %cst_3 = arith.constant -1.000000e+00 : f32
    %32 = vector.broadcast %cst_3 : f32 to vector<16x128xf32>
    %33 = arith.addf %31, %32 : vector<16x128xf32>
    %c0_4 = arith.constant 0 : index
    %c0_5 = arith.constant 0 : index
    %34 = vector.load %arg2[%c0_4, %c0_5] : memref<16x128xf32, #tpu.memory_space<vmem>>, vector<16x128xf32>
    %35 = arith.addf %34, %33 : vector<16x128xf32>
    %cst_6 = arith.constant 0.000000e+00 : f32
    %cst_7 = arith.constant 1.000000e+00 : f32
    %36 = vector.broadcast %cst_6 : f32 to vector<16x128xf32>
    %37 = arith.maximumf %36, %35 : vector<16x128xf32>
    %38 = vector.broadcast %cst_7 : f32 to vector<16x128xf32>
    %39 = arith.minimumf %38, %37 : vector<16x128xf32>
    %c0_8 = arith.constant 0 : index
    %c0_9 = arith.constant 0 : index
    %40 = vector.load %arg3[%c0_8, %c0_9] : memref<16x128xf32, #tpu.memory_space<vmem>>, vector<16x128xf32>
    tpu.vector_store %arg3[%c0_8, %c0_9], %39 {strides = array<i32>} : memref<16x128xf32, #tpu.memory_space<vmem>>, vector<16x128xf32>,
    return
  }
  func.func @transform_0(%arg0: i32, %arg1: memref<1xi32, #tpu.memory_space<smem>>) -> (i32, i32) {
    %c0_i32 = arith.constant 0 : i32
    %c0_i32_0 = arith.constant 0 : i32
    return %arg0, %c0_i32 : i32, i32
  }
  func.func @transform_1(%arg0: i32, %arg1: memref<1xi32, #tpu.memory_space<smem>>) -> (i32, i32) {
    %c0_i32 = arith.constant 0 : i32
    %c0_i32_0 = arith.constant 0 : i32
    return %arg0, %c0_i32 : i32, i32
  }
}

</mosaic_0001>

<bundles_post_ra>
// kernel: _gaussian_noise_jit.1
= control target key start
LH: loop header
LB: loop body
LE: loop exit
PB: predicated region body
PF: predicated region fallthrough
CT: control target
= control target key end

     0   :  { %v10_v0 = vlaneseq  ;;  %s98_s0 = inlined_call_operand.<no memory space> [shape: s32[1], index: 0, kind: input, shape index: {}]   ;;  %s99_s1 = inlined_call_operand.vmem [shape: f32[16,128], index: 1, kind: input, shape index: {}]   ;;  %s100_s2 = inlined_call_operand.vmem [shape: f32[16,128], index: 2, kind: output, shape index: {}]  }
   0x1   :  { %s24_s11 = smul.u32 2654435769, %s98_s0  ;;  %v54_v34 = vld [vmem:[%s99_s1] sm:$0xff]  ;;  %v55_v37 = vld [vmem:[%s99_s1 + $0x8] sm:$0xff] }
   0x2   :  { %v11_v1 = vshrl.u32 %v10_v0, 7  ;;  %v14_v2 = vand.u32 127, %v10_v0 }
   0x3   :  { %v25_v5 = vstv %s24_s11 }
   0x4   :  { %v19_v3 = vmul.u32 128, %v11_v1  ;;  %v12_v4 = vadd.s32 8, %v11_v1 }
   0x6   :  { %v21_v6 = vadd.s32 %v19_v3, %v14_v2  ;;  %v20_v7 = vmul.u32 128, %v12_v4 }
   0x8   :  { %v26_v8 = vadd.s32 %v25_v5, %v21_v6  ;;  %v22_v9 = vadd.s32 %v20_v7, %v14_v2 }
   0xa   :  { %v28_v10 = vshrl.u32 %v26_v8, 16  ;;  %v27_v11 = vadd.s32 %v25_v5, %v22_v9 }
   0xc   :  { %v30_v12 = vxor.u32 %v28_v10, %v26_v8  ;;  %v29_v13 = vshrl.u32 %v27_v11, 16 }
   0xe   :  { %v32_v14 = vmul.u32 2146121005, %v30_v12  ;;  %v31_v15 = vxor.u32 %v29_v13, %v27_v11 }
  0x10   :  { %v34_v16 = vshrl.u32 %v32_v14, 15  ;;  %v33_v17 = vmul.u32 2146121005, %v31_v15 }
  0x12   :  { %v36_v18 = vxor.u32 %v34_v16, %v32_v14  ;;  %v35_v19 = vshrl.u32 %v33_v17, 15 }
  0x14   :  { %v38_v20 = vmul.u32 2221713035, %v36_v18  ;;  %v37_v21 = vxor.u32 %v35_v19, %v33_v17 }
  0x16   :  { %v40_v22 = vshrl.u32 %v38_v20, 16  ;;  %v39_v23 = vmul.u32 2221713035, %v37_v21 }
  0x18   :  { %v42_v24 = vxor.u32 %v40_v22, %v38_v20  ;;  %v41_v25 = vshrl.u32 %v39_v23, 16 }
  0x1a   :  { %v44_v26 = vshrl.u32 %v42_v24, 8  ;;  %v43_v27 = vxor.u32 %v41_v25, %v39_v23 }
  0x1c   :  { %v46_v28 = vcvt.s32.f32 %v44_v26  ;;  %v45_v29 = vshrl.u32 %v43_v27, 8 }
  0x1e   :  { %v48_v30 = vmul.f32 5.9604645e-08, %v46_v28  ;;  %v47_v31 = vcvt.s32.f32 %v45_v29 }
  0x20   :  { %v50_v32 = vmul.f32 2.0, %v48_v30  ;;  %v49_v33 = vmul.f32 5.9604645e-08, %v47_v31 }
  0x22   :  { %v52_v35 = vadd.f32 -1.0, %v50_v32  ;;  %v51_v36 = vmul.f32 2.0, %v49_v33 }
  0x24   :  { %v56_v38 = vadd.f32 %v54_v34, %v52_v35  ;;  %v53_v39 = vadd.f32 -1.0, %v51_v36 }
  0x26   :  { %v58_v40 = vmax.f32 %v56_v38, 0.0  ;;  %v57_v41 = vadd.f32 %v55_v37, %v53_v39 }
  0x28   :  { %v60_v42 = vmin.f32 %v58_v40, 1.0  ;;  %v59_v43 = vmax.f32 %v57_v41, 0.0 }
  0x2a   :  { %62 = vst [vmem:[%s100_s2] sm:$0xff] %v60_v42  ;;  %v61_v44 = vmin.f32 %v59_v43, 1.0 }
  0x2c   :  { %63 = vst [vmem:[%s100_s2 + $0x8] sm:$0xff] %v61_v44 }

</bundles_post_ra>
